<compile_context>
chip_gen: v5e
topology: v5e:2x2
jax: 0.10.0
libtpu: 0.0.40
codegen_flags: <defaults>
</compile_context>

<pallas_src>
import math

import jax
import jax.numpy as jnp
from jax.experimental import pallas as pl
from jax.experimental.pallas import tpu as pltpu

LANE = 128


def _round_up(v, m):
    return (v + m - 1) // m * m


def _vmem_limit(nbytes):
    # TODO(synk): per-generation cap -- v7x has 64 MiB physical VMEM, v5e/v6e 128 MiB.
    return int(min(max(32 * 1024 * 1024, 2 * nbytes), 96 * 1024 * 1024))


def _make_conv_blocks_kernel(L0, block_nums, K, matmul_dtype):
    """Fused ConvBlock stack for ONE batch row:
       [Conv1d(same) -> BN(eval, folded) -> ELU -> MaxPool1d(3,2,1)] * block_nums."""
    pad = (K - 1) // 2

    def kernel(*refs):
        x_ref = refs[0]                                  # (L0, C0_pad) f32
        wb = refs[1:1 + 2 * block_nums]                  # (w_i, b_i) pairs
        out_ref = refs[1 + 2 * block_nums]               # (L_f, C_f_pad) f32
        scr = refs[2 + 2 * block_nums:]                  # per-block maxpool scratch

        x = x_ref[...]                                   # f32, VMEM resident
        L = L0
        for i in range(block_nums):
            w_ref = wb[2 * i]                            # (K, Cin_pad, Cout_pad) matmul_dtype
            b_ref = wb[2 * i + 1]                        # (1, Cout_pad) f32 (BN folded)
            c_out = w_ref.shape[2]

            # position of each row inside the sequence (one batch row per grid step)
            local = jax.lax.broadcasted_iota(jnp.int32, (L, 1), 0)

            # ---- Conv1d (kernel=K, same padding) as K rolled matmuls ----
            y = jnp.broadcast_to(b_ref[...], (L, c_out))          # f32 accumulator = bias
            for t in range(K):
                s = t - pad                                        # tap offset in [-pad, pad]
                if s == 0:
                    xt = x
                else:
                    xt = pltpu.roll(x, shift=(-s) % L, axis=0)     # xt[l] = x[l + s]
                    valid = jnp.logical_and(local + s >= 0, local + s < L)
                    xt = jnp.where(valid, xt, 0.0)                 # zero-pad sequence edges
                y = y + jnp.dot(xt.astype(matmul_dtype), w_ref[t],
                                preferred_element_type=jnp.float32)

            # ---- ELU(alpha=1); clamp inside exp so the discarded branch stays finite ----
            y = jnp.where(y > 0.0, y, jnp.exp(jnp.minimum(y, 0.0)) - 1.0)

            # ---- MaxPool1d(kernel=3, stride=2, padding=1) ----
            # m[l] = max(y[l], y[l-1]) with the left edge padded by -1e30 (< any ELU output)
            # pooled[j] = max(m[2j], m[2j+1]) = max(y[2j-1], y[2j], y[2j+1])
            y_prev = pltpu.roll(y, shift=1, axis=0)
            y_prev = jnp.where(local == 0, -1e30, y_prev)
            scr[i][...] = jnp.maximum(y, y_prev)
            Lh = L // 2
            even = scr[i][pl.ds(0, Lh, stride=2), :]
            odd = scr[i][pl.ds(1, Lh, stride=2), :]
            x = jnp.maximum(even, odd)                             # (Lh, Cout_pad) f32
            L = Lh

        out_ref[...] = x                                           # (L_f, C_f_pad)

    return kernel


def _make_proj_kernel(matmul_dtype):
    """Flatten + Conv1d(kernel_size=1) projection as one lane-dense matmul per M tile."""
    def kernel(h_ref, wp_ref, bp_ref, out_ref):
        h = h_ref[...].astype(matmul_dtype)                        # (B, N_pad)
        out_ref[...] = bp_ref[...] + jnp.dot(h, wp_ref[...],
                                             preferred_element_type=jnp.float32)
    return kernel


class EncoderPallas:
    def __init__(self, d_model, kernel, dropout, group, block_nums,
                 label_len, pred_len, c_out, key, FE="ResNet",
                 matmul_dtype=jnp.bfloat16):
        assert group == 1, "grouped conv supported for group=1 only"          # TODO(synk)
        assert kernel % 2 == 1, "even kernels need asymmetric padding"        # TODO(synk)
        assert label_len % (2 ** block_nums) == 0
        del dropout, FE  # dropout: inference no-op; FE unused (ConvBlock undefined)

        self.d_model = d_model
        self.kernel = kernel
        self.block_nums = block_nums
        self.label_len = label_len
        self.pred_len = pred_len
        self.c_out = c_out
        self.matmul_dtype = matmul_dtype

        eps = 1e-5
        bn_scale = 1.0 / math.sqrt(1.0 + eps)   # BN eval fold: gamma=1, beta=0, mean=0, var=1

        # unpadded f32 copies kept for the pure-JAX parity reference
        self.conv_w_ref, self.conv_b_ref = [], []
        conv_w_pad, conv_b_pad = [], []
        for i in range(block_nums):
            ci = d_model * 2 ** i
            co = d_model * 2 ** (i + 1)
            ci_p, co_p = _round_up(ci, LANE), _round_up(co, LANE)
            key, k1, k2 = jax.random.split(key, 3)
            w = jax.random.normal(k1, (kernel, ci, co), jnp.float32) / math.sqrt(kernel * ci)
            b = jax.random.normal(k2, (co,), jnp.float32) * 0.01
            w_f = w * bn_scale
            b_f = b * bn_scale
            self.conv_w_ref.append(w_f)
            self.conv_b_ref.append(b_f)
            w_p = jnp.zeros((kernel, ci_p, co_p), jnp.float32).at[:, :ci, :co].set(w_f)
            b_p = jnp.zeros((1, co_p), jnp.float32).at[:, :co].set(b_f)
            conv_w_pad.append(w_p.astype(matmul_dtype))
            conv_b_pad.append(b_p)

        L_f = label_len // 2 ** block_nums
        C_f = d_model * 2 ** block_nums
        C_f_p = _round_up(C_f, LANE)
        M = pred_len * c_out
        M_p = _round_up(M, LANE)
        N = L_f * C_f
        key, k1, k2 = jax.random.split(key, 3)
        # wp[l, c, m] == W_conv1d[m, l*C_f + c, 0]  (PyTorch Flatten(permute(0,2,1)) order)
        wp = jax.random.normal(k1, (L_f, C_f, M), jnp.float32) / math.sqrt(N)
        bp = jax.random.normal(k2, (M,), jnp.float32) * 0.01
        self.wp_ref, self.bp_ref = wp, bp
        wp_p = jnp.zeros((L_f, C_f_p, M_p), jnp.float32).at[:, :C_f, :M].set(wp)
        wp_pad = wp_p.reshape(L_f * C_f_p, M_p).astype(matmul_dtype)   # single-matmul weight
        bp_pad = jnp.zeros((1, M_p), jnp.float32).at[:, :M].set(bp)

        self._L_f, self._C_f_p, self._M = L_f, C_f_p, M
        self._params = (tuple(conv_w_pad), tuple(conv_b_pad), wp_pad, bp_pad)
        self._fwd = jax.jit(self._forward)   # jit cache keyed by input shape (per batch size)

    # ------------------------------------------------------------------ forward
    def _forward(self, x, params):
        conv_ws, conv_bs, wp, bp = params
        B, C, L = x.shape
        K, nb = self.kernel, self.block_nums
        L_f, C_f_p = self._L_f, self._C_f_p
        C0_p = conv_ws[0].shape[1]

        # ---- Stage 1: fused ConvBlocks, "parallel" grid over batch rows ----
        xT = jnp.transpose(x, (0, 2, 1))                       # (B, L, C)
        x_p = jnp.pad(xT, ((0, 0), (0, 0), (0, C0_p - C)))     # lane-pad channels to 128

        in_specs = [pl.BlockSpec((None, L, C0_p), lambda b: (b, 0, 0))]
        args = [x_p]
        scratch = []
        flops = trans = 0
        wgt_bytes = 0
        Li = L
        for i in range(nb):
            w, bb = conv_ws[i], conv_bs[i]
            in_specs.append(pl.BlockSpec(w.shape, lambda b: (0, 0, 0)))
            in_specs.append(pl.BlockSpec(bb.shape, lambda b: (0, 0)))
            args += [w, bb]
            scratch.append(pltpu.VMEM((Li, w.shape[2]), jnp.float32))
            flops += 2 * B * Li * w.shape[1] * w.shape[2] * K
            trans += B * Li * w.shape[2]
            wgt_bytes += w.size * w.dtype.itemsize + bb.size * 4
            Li //= 2

        scratch_bytes = sum((L // 2 ** i) * conv_ws[i].shape[2] * 4 for i in range(nb))
        vmem1 = 2 * (L * C0_p * 4 + L_f * C_f_p * 4) + 2 * wgt_bytes + scratch_bytes

        h = pl.pallas_call(
            _make_conv_blocks_kernel(L, nb, K, self.matmul_dtype),
            out_shape=jax.ShapeDtypeStruct((B, L_f, C_f_p), jnp.float32),
            grid=(B,),
            in_specs=in_specs,
            out_specs=pl.BlockSpec((None, L_f, C_f_p), lambda b: (b, 0, 0)),
            scratch_shapes=scratch,
            compiler_params=pltpu.CompilerParams(
                dimension_semantics=("parallel",),
                vmem_limit_bytes=_vmem_limit(vmem1)),
            cost_estimate=pl.CostEstimate(
                flops=int(flops), transcendentals=int(trans),
                bytes_accessed=int(x_p.size * 4 + wgt_bytes + B * L_f * C_f_p * 4)),
        )(*args)

        # ---- Stage 2: single-matmul projection, "parallel" grid over M tiles ----
        h2 = h.reshape(B, L_f * C_f_p)                         # flatten order = l*C_pad + c
        N_p, M_p = wp.shape
        tM = 512 if M_p % 512 == 0 else (256 if M_p % 256 == 0 else 128)
        tM = min(tM, M_p)
        vmem2 = 2 * (B * N_p * 4 + N_p * tM * wp.dtype.itemsize + tM * 4 + B * tM * 4)

        out = pl.pallas_call(
            _make_proj_kernel(self.matmul_dtype),
            out_shape=jax.ShapeDtypeStruct((B, M_p), jnp.float32),
            grid=(M_p // tM,),
            in_specs=[pl.BlockSpec((B, N_p), lambda j: (0, 0)),
                      pl.BlockSpec((N_p, tM), lambda j: (0, j)),     # wp streamed per M tile
                      pl.BlockSpec((1, tM), lambda j: (0, j))],
            out_specs=pl.BlockSpec((B, tM), lambda j: (0, j)),
            compiler_params=pltpu.CompilerParams(
                dimension_semantics=("parallel",),
                vmem_limit_bytes=_vmem_limit(vmem2)),
            cost_estimate=pl.CostEstimate(
                flops=int(2 * B * N_p * M_p), transcendentals=0,
                bytes_accessed=int(B * N_p * 4 + N_p * M_p * wp.dtype.itemsize
                                   + M_p * 4 + B * M_p * 4)),
        )(h2, wp, bp)

        # .squeeze().view(-1, c_out, pred_len).transpose(1, 2)
        out = out[:, :self._M].reshape(B, self.c_out, self.pred_len)
        return jnp.transpose(out, (0, 2, 1))

    def __call__(self, x_ncl):
        B, C, L = x_ncl.shape
        assert C == self.d_model and L == self.label_len
        return self._fwd(x_ncl, self._params)


# ------------------------------------------------------------------ pure-JAX reference
def encoder_reference(x, enc):
    """f32 reference of the assumed Encoder forward (for parity checking)."""
    h = jnp.transpose(x, (0, 2, 1)).astype(jnp.float32)        # (B, L, C)
    pad = (enc.kernel - 1) // 2
    for i in range(enc.block_nums):
        w, b = enc.conv_w_ref[i], enc.conv_b_ref[i]
        B, L, _ = h.shape
        hp = jnp.pad(h, ((0, 0), (pad, pad), (0, 0)))
        y = jnp.zeros((B, L, w.shape[2]), jnp.float32) + b
        for t in range(enc.kernel):
            y = y + jnp.einsum("blc,cd->bld", hp[:, t:t + L, :], w[t],
                               precision=jax.lax.Precision.HIGHEST)
        y = jnp.where(y > 0.0, y, jnp.exp(jnp.minimum(y, 0.0)) - 1.0)
        yp = jnp.pad(y, ((0, 0), (1, 1), (0, 0)), constant_values=-jnp.inf)
        h = jnp.maximum(jnp.maximum(yp[:, 0:-2:2], yp[:, 1:-1:2]), yp[:, 2::2])
    B, L_f, C_f = h.shape
    f = h.reshape(B, L_f * C_f)
    out = jnp.dot(f, enc.wp_ref.reshape(L_f * C_f, -1),
                  precision=jax.lax.Precision.HIGHEST) + enc.bp_ref
    out = out.reshape(B, enc.c_out, enc.pred_len)
    return jnp.transpose(out, (0, 2, 1))


if __name__ == "__main__":
    B, d_model, label_len = 2, 8, 16
    block_nums, kernel_size = 2, 3
    pred_len, c_out, group, dropout = 8, 4, 1, 0.0

    key = jax.random.PRNGKey(0)
    k_x, k_params = jax.random.split(key)

    enc = EncoderPallas(d_model, kernel_size, dropout, group, block_nums,
                        label_len, pred_len, c_out, k_params)

    x = jax.random.normal(k_x, (B, d_model, label_len), jnp.float32)   # NCL input

    out = jax.block_until_ready(enc(x))
    assert out.shape == (B, pred_len, c_out), out.shape
    assert bool(jnp.all(jnp.isfinite(out)))

    ref = encoder_reference(x, enc)
    max_err = float(jnp.max(jnp.abs(out - ref)))
    assert jnp.allclose(out, ref, rtol=1e-1, atol=5e-2), f"max abs err {max_err}"

    _ = jax.block_until_ready(enc(x))   # second call hits the jit cache (no rebuild)
    print("KERNEL_OK")
</pallas_src>

<mosaic_0001>
module attributes {stable_mosaic.version = 11 : i64} {
  func.func @kernel(%arg0: i32, %arg1: memref<2x512xf32, #tpu.memory_space<vmem>>, %arg2: memref<512x128xbf16, #tpu.memory_space<vmem>>, %arg3: memref<1x128xf32, #tpu.memory_space<vmem>>, %arg4: memref<2x128xf32, #tpu.memory_space<vmem>>) attributes {dimension_semantics = [#tpu.dimension_semantics<parallel>], iteration_bounds = array<i64: 1>, scalar_prefetch = 0 : i64, scratch_operands = 0 : i64, tpu.core_type = #tpu.core_type<tc>, window_params = [{pipeline_mode = #tpu.pipeline_mode<synchronous>, transform_indices = @transform_0, window_bounds = array<i64: 2, 512>}, {transform_indices = @transform_1, window_bounds = array<i64: 512, 128>}, {transform_indices = @transform_2, window_bounds = array<i64: 1, 128>}, {transform_indices = @transform_3, window_bounds = array<i64: 2, 128>}]} {
    %c0 = arith.constant 0 : index
    %c0_0 = arith.constant 0 : index
    %0 = vector.load %arg1[%c0, %c0_0] : memref<2x512xf32, #tpu.memory_space<vmem>>, vector<2x512xf32>
    %1 = arith.truncf %0 : vector<2x512xf32> to vector<2x512xbf16>
    %c0_1 = arith.constant 0 : index
    %c0_2 = arith.constant 0 : index
    %2 = vector.load %arg3[%c0_1, %c0_2] : memref<1x128xf32, #tpu.memory_space<vmem>>, vector<1x128xf32>
    %c0_3 = arith.constant 0 : index
    %c0_4 = arith.constant 0 : index
    %3 = vector.load %arg2[%c0_3, %c0_4] : memref<512x128xbf16, #tpu.memory_space<vmem>>, vector<512x128xbf16>
    %cst = arith.constant dense<0.000000e+00> : vector<2x128xf32>
    %4 = tpu.matmul %1, %3, %cst {dimension_numbers = #tpu.dot_dimension_numbers<[1], [0], [0], [1], [0, 0, 1, 1], [], []>} : vector<2x512xbf16>, vector<512x128xbf16>, vector<2x128xf32> -> vector<2x128xf32>
    %5 = vector.broadcast %2 : vector<1x128xf32> to vector<2x128xf32>
    %6 = arith.addf %5, %4 : vector<2x128xf32>
    %c0_5 = arith.constant 0 : index
    %c0_6 = arith.constant 0 : index
    %7 = vector.load %arg4[%c0_5, %c0_6] : memref<2x128xf32, #tpu.memory_space<vmem>>, vector<2x128xf32>
    tpu.vector_store %arg4[%c0_5, %c0_6], %6 {strides = array<i32>} : memref<2x128xf32, #tpu.memory_space<vmem>>, vector<2x128xf32>,
    return
  }
  func.func @transform_0(%arg0: i32) -> (i32, i32) {
    %c0_i32 = arith.constant 0 : i32
    %c0_i32_0 = arith.constant 0 : i32
    %c0_i32_1 = arith.constant 0 : i32
    return %c0_i32, %c0_i32_0 : i32, i32
  }
  func.func @transform_1(%arg0: i32) -> (i32, i32) {
    %c0_i32 = arith.constant 0 : i32
    %c0_i32_0 = arith.constant 0 : i32
    return %c0_i32, %arg0 : i32, i32
  }
  func.func @transform_2(%arg0: i32) -> (i32, i32) {
    %c0_i32 = arith.constant 0 : i32
    %c0_i32_0 = arith.constant 0 : i32
    return %c0_i32, %arg0 : i32, i32
  }
  func.func @transform_3(%arg0: i32) -> (i32, i32) {
    %c0_i32 = arith.constant 0 : i32
    %c0_i32_0 = arith.constant 0 : i32
    return %c0_i32, %arg0 : i32, i32
  }
}

module attributes {stable_mosaic.version = 11 : i64} {
  func.func @kernel(%arg0: i32, %arg1: memref<1x16x128xf32, #tpu.memory_space<vmem>>, %arg2: memref<3x128x128xbf16, #tpu.memory_space<vmem>>, %arg3: memref<1x128xf32, #tpu.memory_space<vmem>>, %arg4: memref<3x128x128xbf16, #tpu.memory_space<vmem>>, %arg5: memref<1x128xf32, #tpu.memory_space<vmem>>, %arg6: memref<1x4x128xf32, #tpu.memory_space<vmem>>, %arg7: memref<16x128xf32, #tpu.memory_space<vmem>>, %arg8: memref<8x128xf32, #tpu.memory_space<vmem>>) attributes {dimension_semantics = [#tpu.dimension_semantics<parallel>], iteration_bounds = array<i64: 2>, scalar_prefetch = 0 : i64, scratch_operands = 2 : i64, tpu.core_type = #tpu.core_type<tc>, window_params = [{transform_indices = @transform_0, window_bounds = array<i64: 1, 16, 128>}, {pipeline_mode = #tpu.pipeline_mode<synchronous>, transform_indices = @transform_1, window_bounds = array<i64: 3, 128, 128>}, {pipeline_mode = #tpu.pipeline_mode<synchronous>, transform_indices = @transform_2, window_bounds = array<i64: 1, 128>}, {pipeline_mode = #tpu.pipeline_mode<synchronous>, transform_indices = @transform_3, window_bounds = array<i64: 3, 128, 128>}, {pipeline_mode = #tpu.pipeline_mode<synchronous>, transform_indices = @transform_4, window_bounds = array<i64: 1, 128>}, {transform_indices = @transform_5, window_bounds = array<i64: 1, 4, 128>}]} {
    %c0 = arith.constant 0 : index
    %c0_0 = arith.constant 0 : index
    %c0_1 = arith.constant 0 : index
    %0 = vector.load %arg1[%c0, %c0_0, %c0_1] : memref<1x16x128xf32, #tpu.memory_space<vmem>>, vector<1x16x128xf32>
    %1 = vector.shape_cast %0 : vector<1x16x128xf32> to vector<16x128xf32>
    %2 = tpu.iota {dimensions = array<i32: 0>} : vector<16x1xi32>
    %c0_2 = arith.constant 0 : index
    %c0_3 = arith.constant 0 : index
    %3 = vector.load %arg3[%c0_2, %c0_3] : memref<1x128xf32, #tpu.memory_space<vmem>>, vector<1x128xf32>
    %4 = vector.shape_cast %3 : vector<1x128xf32> to vector<1x128xf32>
    %5 = vector.broadcast %4 : vector<1x128xf32> to vector<16x128xf32>
    %c1_i32 = arith.constant 1 : i32
    %6 = tpu.dynamic_rotate %1 by %c1_i32 dim 0 : vector<16x128xf32>, i32 -> vector<16x128xf32>
    %c-1_i32 = arith.constant -1 : i32
    %7 = vector.broadcast %c-1_i32 : i32 to vector<16x1xi32>
    %8 = arith.addi %2, %7 : vector<16x1xi32>
    %c0_i32 = arith.constant 0 : i32
    %9 = vector.broadcast %c0_i32 : i32 to vector<16x1xi32>
    %10 = arith.cmpi sge, %8, %9 : vector<16x1xi32>
    %c-1_i32_4 = arith.constant -1 : i32
    %11 = vector.broadcast %c-1_i32_4 : i32 to vector<16x1xi32>
    %12 = arith.addi %2, %11 : vector<16x1xi32>
    %c16_i32 = arith.constant 16 : i32
    %13 = vector.broadcast %c16_i32 : i32 to vector<16x1xi32>
    %14 = arith.cmpi slt, %12, %13 : vector<16x1xi32>
    %15 = arith.andi %10, %14 : vector<16x1xi1>
    %cst = arith.constant 0.000000e+00 : f32
    %16 = vector.shape_cast %15 : vector<16x1xi1> to vector<16x1xi1>
    %17 = vector.broadcast %16 : vector<16x1xi1> to vector<16x128xi1>
    %18 = vector.broadcast %cst : f32 to vector<16x128xf32>
    %19 = arith.select %17, %6, %18 : vector<16x128xi1>, vector<16x128xf32>
    %20 = arith.truncf %19 : vector<16x128xf32> to vector<16x128xbf16>
    %c0_5 = arith.constant 0 : index
    %c0_6 = arith.constant 0 : index
    %c0_7 = arith.constant 0 : index
    %21 = vector.load %arg2[%c0_5, %c0_6, %c0_7] : memref<3x128x128xbf16, #tpu.memory_space<vmem>>, vector<1x128x128xbf16>
    %22 = vector.shape_cast %21 : vector<1x128x128xbf16> to vector<128x128xbf16>
    %cst_8 = arith.constant dense<0.000000e+00> : vector<16x128xf32>
    %23 = tpu.matmul %20, %22, %cst_8 {dimension_numbers = #tpu.dot_dimension_numbers<[1], [0], [0], [1], [0, 0, 1, 1], [], []>} : vector<16x128xbf16>, vector<128x128xbf16>, vector<16x128xf32> -> vector<16x128xf32>
    %24 = arith.addf %5, %23 : vector<16x128xf32>
    %25 = arith.truncf %1 : vector<16x128xf32> to vector<16x128xbf16>
    %c1 = arith.constant 1 : index
    %c0_9 = arith.constant 0 : index
    %c0_10 = arith.constant 0 : index
    %26 = vector.load %arg2[%c1, %c0_9, %c0_10] : memref<3x128x128xbf16, #tpu.memory_space<vmem>>, vector<1x128x128xbf16>
    %27 = vector.shape_cast %26 : vector<1x128x128xbf16> to vector<128x128xbf16>
    %cst_11 = arith.constant dense<0.000000e+00> : vector<16x128xf32>
    %28 = tpu.matmul %25, %27, %cst_11 {dimension_numbers = #tpu.dot_dimension_numbers<[1], [0], [0], [1], [0, 0, 1, 1], [], []>} : vector<16x128xbf16>, vector<128x128xbf16>, vector<16x128xf32> -> vector<16x128xf32>
    %29 = arith.addf %24, %28 : vector<16x128xf32>
    %c15_i32 = arith.constant 15 : i32
    %30 = tpu.dynamic_rotate %1 by %c15_i32 dim 0 : vector<16x128xf32>, i32 -> vector<16x128xf32>
    %c1_i32_12 = arith.constant 1 : i32
    %31 = vector.broadcast %c1_i32_12 : i32 to vector<16x1xi32>
    %32 = arith.addi %2, %31 : vector<16x1xi32>
    %c0_i32_13 = arith.constant 0 : i32
    %33 = vector.broadcast %c0_i32_13 : i32 to vector<16x1xi32>
    %34 = arith.cmpi sge, %32, %33 : vector<16x1xi32>
    %c1_i32_14 = arith.constant 1 : i32
    %35 = vector.broadcast %c1_i32_14 : i32 to vector<16x1xi32>
    %36 = arith.addi %2, %35 : vector<16x1xi32>
    %c16_i32_15 = arith.constant 16 : i32
    %37 = vector.broadcast %c16_i32_15 : i32 to vector<16x1xi32>
    %38 = arith.cmpi slt, %36, %37 : vector<16x1xi32>
    %39 = arith.andi %34, %38 : vector<16x1xi1>
    %cst_16 = arith.constant 0.000000e+00 : f32
    %40 = vector.shape_cast %39 : vector<16x1xi1> to vector<16x1xi1>
    %41 = vector.broadcast %40 : vector<16x1xi1> to vector<16x128xi1>
    %42 = vector.broadcast %cst_16 : f32 to vector<16x128xf32>
    %43 = arith.select %41, %30, %42 : vector<16x128xi1>, vector<16x128xf32>
    %44 = arith.truncf %43 : vector<16x128xf32> to vector<16x128xbf16>
    %c2 = arith.constant 2 : index
    %c0_17 = arith.constant 0 : index
    %c0_18 = arith.constant 0 : index
    %45 = vector.load %arg2[%c2, %c0_17, %c0_18] : memref<3x128x128xbf16, #tpu.memory_space<vmem>>, vector<1x128x128xbf16>
    %46 = vector.shape_cast %45 : vector<1x128x128xbf16> to vector<128x128xbf16>
    %cst_19 = arith.constant dense<0.000000e+00> : vector<16x128xf32>
    %47 = tpu.matmul %44, %46, %cst_19 {dimension_numbers = #tpu.dot_dimension_numbers<[1], [0], [0], [1], [0, 0, 1, 1], [], []>} : vector<16x128xbf16>, vector<128x128xbf16>, vector<16x128xf32> -> vector<16x128xf32>
    %48 = arith.addf %29, %47 : vector<16x128xf32>
    %cst_20 = arith.constant 0.000000e+00 : f32
    %49 = vector.broadcast %cst_20 : f32 to vector<16x128xf32>
    %50 = arith.cmpf ogt, %48, %49 : vector<16x128xf32>
    %cst_21 = arith.constant 0.000000e+00 : f32
    %51 = vector.broadcast %cst_21 : f32 to vector<16x128xf32>
    %52 = arith.minimumf %48, %51 : vector<16x128xf32>
    %53 = math.exp %52 : vector<16x128xf32>
    %cst_22 = arith.constant 1.000000e+00 : f32
    %54 = vector.broadcast %cst_22 : f32 to vector<16x128xf32>
    %55 = arith.subf %53, %54 : vector<16x128xf32>
    %56 = arith.select %50, %48, %55 : vector<16x128xi1>, vector<16x128xf32>
    %c1_i32_23 = arith.constant 1 : i32
    %57 = tpu.dynamic_rotate %56 by %c1_i32_23 dim 0 : vector<16x128xf32>, i32 -> vector<16x128xf32>
    %c0_i32_24 = arith.constant 0 : i32
    %58 = vector.broadcast %c0_i32_24 : i32 to vector<16x1xi32>
    %59 = arith.cmpi eq, %2, %58 : vector<16x1xi32>
    %cst_25 = arith.constant -1.000000e+30 : f32
    %60 = vector.shape_cast %59 : vector<16x1xi1> to vector<16x1xi1>
    %61 = vector.broadcast %60 : vector<16x1xi1> to vector<16x128xi1>
    %62 = vector.broadcast %cst_25 : f32 to vector<16x128xf32>
    %63 = arith.select %61, %62, %57 : vector<16x128xi1>, vector<16x128xf32>
    %64 = arith.maximumf %56, %63 : vector<16x128xf32>
    %c0_26 = arith.constant 0 : index
    %c0_27 = arith.constant 0 : index
    %65 = vector.load %arg7[%c0_26, %c0_27] : memref<16x128xf32, #tpu.memory_space<vmem>>, vector<16x128xf32>
    tpu.vector_store %arg7[%c0_26, %c0_27], %64 {strides = array<i32>} : memref<16x128xf32, #tpu.memory_space<vmem>>, vector<16x128xf32>,
    %c0_28 = arith.constant 0 : index
    %c0_29 = arith.constant 0 : index
    %66 = tpu.strided_load %arg7[%c0_28, %c0_29] {strides = array<i32: 2, 1>} : memref<16x128xf32, #tpu.memory_space<vmem>>, vector<8x128xf32>
    %c1_30 = arith.constant 1 : index
    %c0_31 = arith.constant 0 : index
    %67 = tpu.strided_load %arg7[%c1_30, %c0_31] {strides = array<i32: 2, 1>} : memref<16x128xf32, #tpu.memory_space<vmem>>, vector<8x128xf32>
    %68 = arith.maximumf %66, %67 : vector<8x128xf32>
    %69 = tpu.iota {dimensions = array<i32: 0>} : vector<8x1xi32>
    %c0_32 = arith.constant 0 : index
    %c0_33 = arith.constant 0 : index
    %70 = vector.load %arg5[%c0_32, %c0_33] : memref<1x128xf32, #tpu.memory_space<vmem>>, vector<1x128xf32>
    %71 = vector.shape_cast %70 : vector<1x128xf32> to vector<1x128xf32>
    %72 = vector.broadcast %71 : vector<1x128xf32> to vector<8x128xf32>
    %c1_i32_34 = arith.constant 1 : i32
    %73 = tpu.dynamic_rotate %68 by %c1_i32_34 dim 0 : vector<8x128xf32>, i32 -> vector<8x128xf32>
    %c-1_i32_35 = arith.constant -1 : i32
    %74 = vector.broadcast %c-1_i32_35 : i32 to vector<8x1xi32>
    %75 = arith.addi %69, %74 : vector<8x1xi32>
    %c0_i32_36 = arith.constant 0 : i32
    %76 = vector.broadcast %c0_i32_36 : i32 to vector<8x1xi32>
    %77 = arith.cmpi sge, %75, %76 : vector<8x1xi32>
    %c-1_i32_37 = arith.constant -1 : i32
    %78 = vector.broadcast %c-1_i32_37 : i32 to vector<8x1xi32>
    %79 = arith.addi %69, %78 : vector<8x1xi32>
    %c8_i32 = arith.constant 8 : i32
    %80 = vector.broadcast %c8_i32 : i32 to vector<8x1xi32>
    %81 = arith.cmpi slt, %79, %80 : vector<8x1xi32>
    %82 = arith.andi %77, %81 : vector<8x1xi1>
    %cst_38 = arith.constant 0.000000e+00 : f32
    %83 = vector.shape_cast %82 : vector<8x1xi1> to vector<8x1xi1>
    %84 = vector.broadcast %83 : vector<8x1xi1> to vector<8x128xi1>
    %85 = vector.broadcast %cst_38 : f32 to vector<8x128xf32>
    %86 = arith.select %84, %73, %85 : vector<8x128xi1>, vector<8x128xf32>
    %87 = arith.truncf %86 : vector<8x128xf32> to vector<8x128xbf16>
    %c0_39 = arith.constant 0 : index
    %c0_40 = arith.constant 0 : index
    %c0_41 = arith.constant 0 : index
    %88 = vector.load %arg4[%c0_39, %c0_40, %c0_41] : memref<3x128x128xbf16, #tpu.memory_space<vmem>>, vector<1x128x128xbf16>
    %89 = vector.shape_cast %88 : vector<1x128x128xbf16> to vector<128x128xbf16>
    %cst_42 = arith.constant dense<0.000000e+00> : vector<8x128xf32>
    %90 = tpu.matmul %87, %89, %cst_42 {dimension_numbers = #tpu.dot_dimension_numbers<[1], [0], [0], [1], [0, 0, 1, 1], [], []>} : vector<8x128xbf16>, vector<128x128xbf16>, vector<8x128xf32> -> vector<8x128xf32>
    %91 = arith.addf %72, %90 : vector<8x128xf32>
    %92 = arith.truncf %68 : vector<8x128xf32> to vector<8x128xbf16>
    %c1_43 = arith.constant 1 : index
    %c0_44 = arith.constant 0 : index
    %c0_45 = arith.constant 0 : index
    %93 = vector.load %arg4[%c1_43, %c0_44, %c0_45] : memref<3x128x128xbf16, #tpu.memory_space<vmem>>, vector<1x128x128xbf16>
    %94 = vector.shape_cast %93 : vector<1x128x128xbf16> to vector<128x128xbf16>
    %cst_46 = arith.constant dense<0.000000e+00> : vector<8x128xf32>
    %95 = tpu.matmul %92, %94, %cst_46 {dimension_numbers = #tpu.dot_dimension_numbers<[1], [0], [0], [1], [0, 0, 1, 1], [], []>} : vector<8x128xbf16>, vector<128x128xbf16>, vector<8x128xf32> -> vector<8x128xf32>
    %96 = arith.addf %91, %95 : vector<8x128xf32>
    %c7_i32 = arith.constant 7 : i32
    %97 = tpu.dynamic_rotate %68 by %c7_i32 dim 0 : vector<8x128xf32>, i32 -> vector<8x128xf32>
    %c1_i32_47 = arith.constant 1 : i32
    %98 = vector.broadcast %c1_i32_47 : i32 to vector<8x1xi32>
    %99 = arith.addi %69, %98 : vector<8x1xi32>
    %c0_i32_48 = arith.constant 0 : i32
    %100 = vector.broadcast %c0_i32_48 : i32 to vector<8x1xi32>
    %101 = arith.cmpi sge, %99, %100 : vector<8x1xi32>
    %c1_i32_49 = arith.constant 1 : i32
    %102 = vector.broadcast %c1_i32_49 : i32 to vector<8x1xi32>
    %103 = arith.addi %69, %102 : vector<8x1xi32>
    %c8_i32_50 = arith.constant 8 : i32
    %104 = vector.broadcast %c8_i32_50 : i32 to vector<8x1xi32>
    %105 = arith.cmpi slt, %103, %104 : vector<8x1xi32>
    %106 = arith.andi %101, %105 : vector<8x1xi1>
    %cst_51 = arith.constant 0.000000e+00 : f32
    %107 = vector.shape_cast %106 : vector<8x1xi1> to vector<8x1xi1>
    %108 = vector.broadcast %107 : vector<8x1xi1> to vector<8x128xi1>
    %109 = vector.broadcast %cst_51 : f32 to vector<8x128xf32>
    %110 = arith.select %108, %97, %109 : vector<8x128xi1>, vector<8x128xf32>
    %111 = arith.truncf %110 : vector<8x128xf32> to vector<8x128xbf16>
    %c2_52 = arith.constant 2 : index
    %c0_53 = arith.constant 0 : index
    %c0_54 = arith.constant 0 : index
    %112 = vector.load %arg4[%c2_52, %c0_53, %c0_54] : memref<3x128x128xbf16, #tpu.memory_space<vmem>>, vector<1x128x128xbf16>
    %113 = vector.shape_cast %112 : vector<1x128x128xbf16> to vector<128x128xbf16>
    %cst_55 = arith.constant dense<0.000000e+00> : vector<8x128xf32>
    %114 = tpu.matmul %111, %113, %cst_55 {dimension_numbers = #tpu.dot_dimension_numbers<[1], [0], [0], [1], [0, 0, 1, 1], [], []>} : vector<8x128xbf16>, vector<128x128xbf16>, vector<8x128xf32> -> vector<8x128xf32>
    %115 = arith.addf %96, %114 : vector<8x128xf32>
    %cst_56 = arith.constant 0.000000e+00 : f32
    %116 = vector.broadcast %cst_56 : f32 to vector<8x128xf32>
    %117 = arith.cmpf ogt, %115, %116 : vector<8x128xf32>
    %cst_57 = arith.constant 0.000000e+00 : f32
    %118 = vector.broadcast %cst_57 : f32 to vector<8x128xf32>
    %119 = arith.minimumf %115, %118 : vector<8x128xf32>
    %120 = math.exp %119 : vector<8x128xf32>
    %cst_58 = arith.constant 1.000000e+00 : f32
    %121 = vector.broadcast %cst_58 : f32 to vector<8x128xf32>
    %122 = arith.subf %120, %121 : vector<8x128xf32>
    %123 = arith.select %117, %115, %122 : vector<8x128xi1>, vector<8x128xf32>
    %c1_i32_59 = arith.constant 1 : i32
    %124 = tpu.dynamic_rotate %123 by %c1_i32_59 dim 0 : vector<8x128xf32>, i32 -> vector<8x128xf32>
    %c0_i32_60 = arith.constant 0 : i32
    %125 = vector.broadcast %c0_i32_60 : i32 to vector<8x1xi32>
    %126 = arith.cmpi eq, %69, %125 : vector<8x1xi32>
    %cst_61 = arith.constant -1.000000e+30 : f32
    %127 = vector.shape_cast %126 : vector<8x1xi1> to vector<8x1xi1>
    %128 = vector.broadcast %127 : vector<8x1xi1> to vector<8x128xi1>
    %129 = vector.broadcast %cst_61 : f32 to vector<8x128xf32>
    %130 = arith.select %128, %129, %124 : vector<8x128xi1>, vector<8x128xf32>
    %131 = arith.maximumf %123, %130 : vector<8x128xf32>
    %c0_62 = arith.constant 0 : index
    %c0_63 = arith.constant 0 : index
    %132 = vector.load %arg8[%c0_62, %c0_63] : memref<8x128xf32, #tpu.memory_space<vmem>>, vector<8x128xf32>
    tpu.vector_store %arg8[%c0_62, %c0_63], %131 {strides = array<i32>} : memref<8x128xf32, #tpu.memory_space<vmem>>, vector<8x128xf32>,
    %c0_64 = arith.constant 0 : index
    %c0_65 = arith.constant 0 : index
    %133 = tpu.strided_load %arg8[%c0_64, %c0_65] {strides = array<i32: 2, 1>} : memref<8x128xf32, #tpu.memory_space<vmem>>, vector<4x128xf32>
    %c1_66 = arith.constant 1 : index
    %c0_67 = arith.constant 0 : index
    %134 = tpu.strided_load %arg8[%c1_66, %c0_67] {strides = array<i32: 2, 1>} : memref<8x128xf32, #tpu.memory_space<vmem>>, vector<4x128xf32>
    %135 = arith.maximumf %133, %134 : vector<4x128xf32>
    %c0_68 = arith.constant 0 : index
    %c0_69 = arith.constant 0 : index
    %c0_70 = arith.constant 0 : index
    %136 = vector.load %arg6[%c0_68, %c0_69, %c0_70] : memref<1x4x128xf32, #tpu.memory_space<vmem>>, vector<1x4x128xf32>
    %137 = vector.shape_cast %136 : vector<1x4x128xf32> to vector<4x128xf32>
    %138 = vector.shape_cast %135 : vector<4x128xf32> to vector<1x4x128xf32>
    tpu.vector_store %arg6[%c0_68, %c0_69, %c0_70], %138 {strides = array<i32>} : memref<1x4x128xf32, #tpu.memory_space<vmem>>, vector<1x4x128xf32>,
    return
  }
  func.func @transform_0(%arg0: i32) -> (i32, i32, i32) {
    %c0_i32 = arith.constant 0 : i32
    %c0_i32_0 = arith.constant 0 : i32
    %c0_i32_1 = arith.constant 0 : i32
    return %arg0, %c0_i32, %c0_i32_0 : i32, i32, i32
  }
  func.func @transform_1(%arg0: i32) -> (i32, i32, i32) {
    %c0_i32 = arith.constant 0 : i32
    %c0_i32_0 = arith.constant 0 : i32
    %c0_i32_1 = arith.constant 0 : i32
    %c0_i32_2 = arith.constant 0 : i32
    return %c0_i32, %c0_i32_0, %c0_i32_1 : i32, i32, i32
  }
  func.func @transform_2(%arg0: i32) -> (i32, i32) {
    %c0_i32 = arith.constant 0 : i32
    %c0_i32_0 = arith.constant 0 : i32
    %c0_i32_1 = arith.constant 0 : i32
    return %c0_i32, %c0_i32_0 : i32, i32
  }
  func.func @transform_3(%arg0: i32) -> (i32, i32, i32) {
    %c0_i32 = arith.constant 0 : i32
    %c0_i32_0 = arith.constant 0 : i32
    %c0_i32_1 = arith.constant 0 : i32
    %c0_i32_2 = arith.constant 0 : i32
    return %c0_i32, %c0_i32_0, %c0_i32_1 : i32, i32, i32
  }
  func.func @transform_4(%arg0: i32) -> (i32, i32) {
    %c0_i32 = arith.constant 0 : i32
    %c0_i32_0 = arith.constant 0 : i32
    %c0_i32_1 = arith.constant 0 : i32
    return %c0_i32, %c0_i32_0 : i32, i32
  }
  func.func @transform_5(%arg0: i32) -> (i32, i32, i32) {
    %c0_i32 = arith.constant 0 : i32
    %c0_i32_0 = arith.constant 0 : i32
    %c0_i32_1 = arith.constant 0 : i32
    return %arg0, %c0_i32, %c0_i32_0 : i32, i32, i32
  }
}

</mosaic_0001>

<bundles_post_ra>
// kernel: _forward.3
= control target key start
LH: loop header
LB: loop body
LE: loop exit
PB: predicated region body
PF: predicated region fallthrough
CT: control target
= control target key end

     0   :  { %s633_s1 = inlined_call_operand.vmem [shape: bf16[512,128], index: 1, kind: input, shape index: {}]   ;;  %s634_s0 = inlined_call_operand.vmem [shape: f32[2,512], index: 0, kind: input, shape index: {}]   ;;  %s635_s2 = inlined_call_operand.vmem [shape: f32[1,128], index: 2, kind: input, shape index: {}]   ;;  %s636_s3 = inlined_call_operand.vmem [shape: f32[2,128], index: 3, kind: output, shape index: {}]  }
   0x1   :  { %v482_v0 = vld [vmem:[%s633_s1 + $0x38] sm:$0xff]  ;;  %v481_v4 = vld [vmem:[%s633_s1 + $0x30] sm:$0xff]  ;;  %v480_v8 = vld [vmem:[%s633_s1 + $0x28] sm:$0xff] }
   0x2   :  { %v490_v1 = vld [vmem:[%s633_s1 + $0x78] sm:$0xff]  ;;  %286 = vmatpush.bf16.msra.mxu0 %v482_v0  ;;  %v489_v5 = vld [vmem:[%s633_s1 + $0x70] sm:$0xff]  ;;  %v488_v9 = vld [vmem:[%s633_s1 + $0x68] sm:$0xff] }
   0x3   :  { %v498_v2 = vld [vmem:[%s633_s1 + $0xb8] sm:$0xff]  ;;  %299 = vmatpush.bf16.msra.mxu1 %v490_v1  ;;  %v497_v6 = vld [vmem:[%s633_s1 + $0xb0] sm:$0xff]  ;;  %v496_v10 = vld [vmem:[%s633_s1 + $0xa8] sm:$0xff] }
   0x4   :  { %v506_v3 = vld [vmem:[%s633_s1 + $0xf8] sm:$0xff]  ;;  %312 = vmatpush.bf16.msra.mxu2 %v498_v2  ;;  %v505_v7 = vld [vmem:[%s633_s1 + $0xf0] sm:$0xff]  ;;  %v504_v11 = vld [vmem:[%s633_s1 + $0xe8] sm:$0xff] }
   0x5   :  { %325 = vmatpush.bf16.msra.mxu3 %v506_v3  ;;  %v479_v12 = vld [vmem:[%s633_s1 + $0x20] sm:$0xff]  ;;  %v478_v17 = vld [vmem:[%s633_s1 + $0x18] sm:$0xff]  ;;  %v477_v21 = vld [vmem:[%s633_s1 + $0x10] sm:$0xff] }
   0x6   :  { %287 = vmatpush.bf16.msra.mxu0 %v481_v4  ;;  %v487_v13 = vld [vmem:[%s633_s1 + $0x60] sm:$0xff]  ;;  %v486_v18 = vld [vmem:[%s633_s1 + $0x58] sm:$0xff]  ;;  %v485_v22 = vld [vmem:[%s633_s1 + $0x50] sm:$0xff] }
   0x7   :  { %300 = vmatpush.bf16.msra.mxu1 %v489_v5  ;;  %v14_v14 = vld [vmem:[%s634_s0] sm:$0xff]  ;;  %v494_v19 = vld [vmem:[%s633_s1 + $0x98] sm:$0xff]  ;;  %v493_v23 = vld [vmem:[%s633_s1 + $0x90] sm:$0xff] }
   0x8   :  { %313 = vmatpush.bf16.msra.mxu2 %v497_v6  ;;  %v495_v15 = vld [vmem:[%s633_s1 + $0xa0] sm:$0xff]  ;;  %16 = vst [vmem:[#allocation1] ss:$4 sm:$0xff] %v14_v14  ;;  %v502_v20 = vld [vmem:[%s633_s1 + $0xd8] sm:$0xff]  ;;  %v501_v24 = vld [vmem:[%s633_s1 + $0xd0] sm:$0xff] }
   0x9   :  { %326 = vmatpush.bf16.msra.mxu3 %v505_v7  ;;  %v503_v16 = vld [vmem:[%s633_s1 + $0xe0] sm:$0xff]  ;;  %v476_v25 = vld [vmem:[%s633_s1 + $0x8] sm:$0xff] }
   0xa   :  { %288 = vmatpush.bf16.msra.mxu0 %v480_v8  ;;  %v484_v26 = vld [vmem:[%s633_s1 + $0x48] sm:$0xff]  ;;  %v475_v29 = vld [vmem:[%s633_s1] sm:$0xff] }
   0xb   :  { %301 = vmatpush.bf16.msra.mxu1 %v488_v9  ;;  %v492_v27 = vld [vmem:[%s633_s1 + $0x88] sm:$0xff]  ;;  %v483_v30 = vld [vmem:[%s633_s1 + $0x40] sm:$0xff] }
   0xc   :  { %314 = vmatpush.bf16.msra.mxu2 %v496_v10  ;;  %v500_v28 = vld [vmem:[%s633_s1 + $0xc8] sm:$0xff]  ;;  %v491_v31 = vld [vmem:[%s633_s1 + $0x80] sm:$0xff] }
   0xd   :  { %327 = vmatpush.bf16.msra.mxu3 %v504_v11  ;;  %v499_v32 = vld [vmem:[%s633_s1 + $0xc0] sm:$0xff] }
   0xe   :  { %289 = vmatpush.bf16.msra.mxu0 %v479_v12  ;;  %v507_v47 = vld [vmem:[%s635_s2] ss:$0 sm:$0xff] }
   0xf   :  { %302 = vmatpush.bf16.msra.mxu1 %v487_v13  ;;  %v17_v33 = vld.sshfl [vmem:[#allocation1] sm:$0xff pattern:$0x73625140]  ;;  %v18_v34 = vld.sshfl [vmem:[#allocation1 + $0x8] sm:$0xff pattern:$0x73625140] }
  0x10   :  { %315 = vmatpush.bf16.msra.mxu2 %v495_v15  ;;  %v19_v35 = vld.sshfl [vmem:[#allocation1 + $0x10] sm:$0xff pattern:$0x73625140]  ;;  %v20_v36 = vld.sshfl [vmem:[#allocation1 + $0x18] sm:$0xff pattern:$0x73625140]  ;;  %v25_v37 = vpack.c.bf16 %v17_v33, %v17_v33  ;;  %v26_v38 = vpack.c.bf16 %v18_v34, %v18_v34 }
  0x11   :  { %328 = vmatpush.bf16.msra.mxu3 %v503_v16  ;;  %v27_v39 = vpack.c.bf16 %v19_v35, %v19_v35  ;;  %v28_v40 = vpack.c.bf16 %v20_v36, %v20_v36 }
  0x12   :  { %290 = vmatpush.bf16.msra.mxu0 %v478_v17 }
  0x13   :  { %303 = vmatpush.bf16.msra.mxu1 %v486_v18 }
  0x14   :  { %316 = vmatpush.bf16.msra.mxu2 %v494_v19 }
  0x15   :  { %329 = vmatpush.bf16.msra.mxu3 %v502_v20 }
  0x16   :  { %291 = vmatpush.bf16.msra.mxu0 %v477_v21 }
  0x17   :  { %304 = vmatpush.bf16.msra.mxu1 %v485_v22 }
  0x18   :  { %317 = vmatpush.bf16.msra.mxu2 %v493_v23 }
  0x19   :  { %330 = vmatpush.bf16.msra.mxu3 %v501_v24 }
  0x1a   :  { %292 = vmatpush.bf16.msra.mxu0 %v476_v25 }
  0x1b   :  { %305 = vmatpush.bf16.msra.mxu1 %v484_v26 }
  0x1c   :  { %318 = vmatpush.bf16.msra.mxu2 %v492_v27 }
  0x1d   :  { %331 = vmatpush.bf16.msra.mxu3 %v500_v28 }
  0x1e   :  { %293 = vmatpush.bf16.msra.mxu0 %v475_v29 }
  0x1f   :  { %306 = vmatpush.bf16.msra.mxu1 %v483_v30 }
  0x20   :  { %319 = vmatpush.bf16.msra.mxu2 %v491_v31 }
  0x21   :  { %332 = vmatpush.bf16.msra.mxu3 %v499_v32  ;;  %294 = vmatmul.bf16.vlgmr.msra.gmra.mxu0 %v25_v37 }
  0x22   :  { %307 = vmatmul.bf16.vlgmr.msra.gmra.mxu1 %v26_v38 }
  0x23   :  { %320 = vmatmul.bf16.vlgmr.msra.gmra.mxu2 %v27_v39 }
  0x24   :  { %333 = vmatmul.bf16.vlgmr.msra.gmra.mxu3 %v28_v40 }
  0x9e   :  { %v295_v41 = vpop.f32.mrf.mxu0 }
  0x9f   :  { %v308_v42 = vpop.f32.mrf.mxu1 }
  0xa0   :  { %v309_v43 = vadd.f32 %v308_v42, %v295_v41 }
  0xa6   :  { %v321_v44 = vpop.f32.mrf.mxu2  ;;  %v297_v48 = vpop.f32.mrf.mxu0 }
  0xa7   :  { %v334_v45 = vpop.f32.mrf.mxu3  ;;  %v322_v46 = vadd.f32 %v321_v44, %v309_v43  ;;  %v310_v49 = vpop.f32.mrf.mxu1 }
  0xa9   :  { %v335_v50 = vadd.f32 %v334_v45, %v322_v46 }
  0xab   :  { %v341_v51 = vadd.f32 %v507_v47, %v335_v50 }
  0xad   :  { %342 = vst [vmem:[%s636_s3] sm:$0x3] %v341_v51 }
  0xae   :  { %v323_v52 = vpop.f32.mrf.mxu2 }
  0xaf   :  { %v336_v53 = vpop.f32.mrf.mxu3 }

// kernel: _forward.2
= control target key start
LH: loop header
LB: loop body
LE: loop exit
PB: predicated region body
PF: predicated region fallthrough
CT: control target
= control target key end

     0   :  { %10 = vsyncpa [#allocation5], 0  ;;  %s1431_s0 = inlined_call_operand.vmem [shape: f32[2,16,128], index: 0, kind: input, shape index: {}]   ;;  %s1432_s1 = inlined_call_operand.hbm [shape: bf16[3,128,128], index: 1, kind: input, shape index: {}]   ;;  %s1433_s2 = inlined_call_operand.vmem [shape: f32[1,128], index: 2, kind: input, shape index: {}]   ;;  %s1434_s3 = inlined_call_operand.hbm [shape: bf16[3,128,128], index: 3, kind: input, shape index: {}]   ;;  %s1435_s4 = inlined_call_operand.vmem [shape: f32[1,128], index: 4, kind: input, shape index: {}]   ;;  %s1436_s5 = inlined_call_operand.vmem [shape: f32[2,4,128], index: 5, kind: output, shape index: {}]  }
   0x1   :  { %11 = vsyncpa [#allocation7], 0  ;;  %s1347_s18 = smov 0  }
   0x2 LB: > { %s169_s21 = sshll.u32 %s1432_s1, 4  ;;  %s1356_s22 = sadd.s32 4294967295, %s1310_s18   ;;  %s1310_s18 = sphi %s1347_s18, %s17_s18   ;;  %s170_s21 = int_to_ptr.hbm [resolvable:$true] %s169_s21 }
   0x3   : > { %p928_p0 = scmp.ge.s32.totalorder %s1310_s18, 1  ;;  %p158_p1 = scmp.lt.s32.totalorder %s1310_s18, 3 }
   0x4   : > { %p1211_p2 = scmp.eq.s32.totalorder %s1356_s22, 0  ;;  %s1312_s24 = smov [#allocation4]  }
   0x5   : > { %p1361_p3 = pnand %p928_p0, %p158_p1  ;;  %s171_s25 = sshll.u32 %s1312_s24, 4  ;;  %s172_s25 = int_to_ptr.vmem [resolvable:$true] %s171_s25 }
   0x6   : > { %s186_s28 = sshll.u32 %s1434_s3, 4  ;;  %s1313_s29 = smov [#allocation6]   ;;  %s187_s28 = int_to_ptr.hbm [resolvable:$true] %s186_s28 }
   0x7   : > { %p1204_p4 = pneg %p1361_p3  ;;  %s188_s30 = sshll.u32 %s1313_s29, 4  ;;  %s189_s30 = int_to_ptr.vmem [resolvable:$true] %s188_s30 }
   0x8   : > { %s1314_s6 = smov 64   ;;  %s1315_s7 = smov 4  }
   0x9   : > { %p1205_p5 = pnand %p1211_p2, %p1204_p4  ;;  %215 = sbr.rel (%p1361_p3) target bundleno = 395 (0x18b), region = 40 }
   0xb   : > { %1207 = dma.hbm_to_vmem [thread:$0]  (!%p1205_p5), %s170_s21, 3072, %s172_s25, [#allocation5], %s1314_s6, %s1314_s6, %s1315_s7  }
   0xc   : > { %1210 = dma.hbm_to_vmem [thread:$0]  (!%p1205_p5), %s187_s28, 3072, %s189_s30, [#allocation7], %s1314_s6, %s1314_s6, %s1315_s7  }
   0xe   : > { %1301 = dma.done.wait (%p1211_p2), [#allocation5], 3072  }
   0xf   : > { %1303 = vsyncadd (%p1211_p2), [#allocation5], 4294964224 }
  0x10   : > { %1305 = dma.done.wait (%p1211_p2), [#allocation7], 3072  }
  0x11   : > { %1307 = vsyncadd (%p1211_p2), [#allocation7], 4294964224  ;;  %v1155_v0 = vld [vmem:[#allocation4 + $0x38] sm:$0xff]  ;;  %v1154_v3 = vld [vmem:[#allocation4 + $0x30] sm:$0xff]  ;;  %p248_p6 = scmp.lt.s32.totalorder %s1356_s22, 1  ;;  %v259_v12 = vlaneseq  ;;  %vm1316_vm4 = vmmov 1  }
  0x12   : > { %v1163_v1 = vld [vmem:[#allocation4 + $0x78] sm:$0xff]  ;;  %350 = vmatpush.bf16.msra.mxu0 %v1155_v0  ;;  %v1162_v4 = vld [vmem:[#allocation4 + $0x70] sm:$0xff]  ;;  %v1153_v6 = vld [vmem:[#allocation4 + $0x28] sm:$0xff] }
  0x13   : > { %v1171_v2 = vld [vmem:[#allocation4 + $0xb8] sm:$0xff]  ;;  %432 = vmatpush.bf16.msra.mxu1 %v1163_v1  ;;  %v1170_v5 = vld [vmem:[#allocation4 + $0xb0] sm:$0xff]  ;;  %v1161_v7 = vld [vmem:[#allocation4 + $0x68] sm:$0xff]  ;;  %s1439_s22 = smov (!%p248_p6, %s1356_s22), 1  ;;  %v1390_v16 = vshrl.u32 %v259_v12, 7 }
  0x14   : > { %533 = vmatpush.bf16.msra.mxu2 %v1171_v2  ;;  %v1169_v8 = vld [vmem:[#allocation4 + $0xa8] sm:$0xff]  ;;  %v1152_v9 = vld [vmem:[#allocation4 + $0x20] sm:$0xff]  ;;  %s1147_s8 = sshll.u32 %s1439_s22, 4  ;;  %v1151_v13 = vld [vmem:[#allocation4 + $0x18] sm:$0xff]  ;;  %s937_s16 = sshll.u32 %s1439_s22, 2 }
  0x15   : > { %v1160_v10 = vld [vmem:[#allocation4 + $0x60] sm:$0xff]  ;;  %v1159_v14 = vld [vmem:[#allocation4 + $0x58] sm:$0xff]  ;;  %s252_s11 = scalar_lea.vmem %s1431_s0, %s1147_s8  ;;  %v1150_v17 = vld [vmem:[#allocation4 + $0x10] sm:$0xff]  ;;  %v261_v22 = vadd.s32 8, %v1390_v16  ;;  %vm268_vm0 = vcmp.lt.s32.totalorder %v1390_v16, 1  ;;  %v1395_v28 = vadd.s32 4294967295, %v1390_v16  ;;  %s256_s20 = scalar_lea.vmem %s1436_s5, %s937_s16 }
  0x16   : > { %351 = vmatpush.bf16.msra.mxu0 %v1154_v3  ;;  %v1168_v11 = vld [vmem:[#allocation4 + $0xa0] sm:$0xff]  ;;  %v1167_v15 = vld [vmem:[#allocation4 + $0x98] sm:$0xff]  ;;  %v1158_v18 = vld [vmem:[#allocation4 + $0x50] sm:$0xff]  ;;  %vm450_vm1 = vcmp.lt.s32.totalorder %v1390_v16, 7  ;;  %vm565_vm9 = vcmp.eq.s32.totalorder %v1390_v16, 0 }
  0x17   : > { %433 = vmatpush.bf16.msra.mxu1 %v1162_v4  ;;  %v1166_v19 = vld [vmem:[#allocation4 + $0x90] sm:$0xff]  ;;  %v257_v20 = vld [vmem:[%s252_s11] sm:$0xff]  ;;  %v454_v31 = vadd.s32 1, %v261_v22  ;;  %v1148_v32 = vld [vmem:[#allocation4] sm:$0xff]  ;;  %vm273_vm2 = vcmp.ge.s32.totalorder %v1395_v28, 0 }
  0x18   : > { %534 = vmatpush.bf16.msra.mxu2 %v1170_v5  ;;  %v258_v21 = vld [vmem:[%s252_s11 + $0x8] sm:$0xff]  ;;  %v1149_v23 = vld [vmem:[#allocation4 + $0x8] sm:$0xff]  ;;  %v266_v25 = vrot.slane %v257_v20, 7  ;;  %v448_v29 = vrot.slane %v257_v20, 1  ;;  %v1156_v33 = vld [vmem:[#allocation4 + $0x40] sm:$0xff] }
  0x19   : > { %v1157_v24 = vld [vmem:[#allocation4 + $0x48] sm:$0xff]  ;;  %v267_v26 = vrot.slane %v258_v21, 7  ;;  %v449_v30 = vrot.slane %v258_v21, 1  ;;  %v1164_v36 = vld [vmem:[#allocation4 + $0x80] sm:$0xff]  ;;  %vm458_vm3 = vcmp.lt.s32.totalorder %v454_v31, 16  ;;  %v366_v40 = vpack.c.bf16 %v258_v21, %v257_v20  ;;  %vm970_vm5 = vmpackc.low %vm1316_vm4, %vm273_vm2 }
  0x1a   : > { %352 = vmatpush.bf16.msra.mxu0 %v1153_v6  ;;  %v1165_v27 = vld [vmem:[#allocation4 + $0x88] sm:$0xff]  ;;  %vm1037_vm6 = vmpackc.low %vm458_vm3, %vm1316_vm4  ;;  %v1187_v42 = vld [vmem:[#allocation6 + $0x78] sm:$0xff] }
  0x1b   : > { %434 = vmatpush.bf16.msra.mxu1 %v1161_v7  ;;  %v269_v34 = vsel %vm268_vm0, %v266_v25, %v267_v26  ;;  %v270_v35 = vsel %vm268_vm0, %v267_v26, %v266_v25  ;;  %v451_v37 = vsel %vm450_vm1, %v448_v29, %v449_v30  ;;  %v452_v38 = vsel %vm450_vm1, %v449_v30, %v448_v29  ;;  %v1179_v43 = vld [vmem:[#allocation6 + $0x38] sm:$0xff]  ;;  %v1186_v45 = vld [vmem:[#allocation6 + $0x70] sm:$0xff]  ;;  %v1185_v48 = vld [vmem:[#allocation6 + $0x68] sm:$0xff] }
  0x1c   : > { %535 = vmatpush.bf16.msra.mxu2 %v1169_v8  ;;  %v971_v39 = vpack.c.bf16 %v269_v34, %v270_v35  ;;  %v1038_v41 = vpack.c.bf16 %v452_v38, %v451_v37  ;;  %v1195_v44 = vld [vmem:[#allocation6 + $0xb8] sm:$0xff]  ;;  %656 = vmatpush.bf16.msra.mxu3 %v1179_v43  ;;  %v1178_v46 = vld [vmem:[#allocation6 + $0x30] sm:$0xff]  ;;  %v1177_v49 = vld [vmem:[#allocation6 + $0x28] sm:$0xff]  ;;  %v453_v34 = vadd.s32 1, %v1390_v16 }
  0x1d   : > { %v1194_v47 = vld [vmem:[#allocation6 + $0xb0] sm:$0xff]  ;;  %v1193_v50 = vld [vmem:[#allocation6 + $0xa8] sm:$0xff]  ;;  %v1184_v52 = vld [vmem:[#allocation6 + $0x60] sm:$0xff] }
  0x1e   : > { %353 = vmatpush.bf16.msra.mxu0 %v1152_v9  ;;  %v1228_v51 = vld [vmem:[%s1433_s2] ss:$0 sm:$0xff]  ;;  %v1176_v53 = vld [vmem:[#allocation6 + $0x20] sm:$0xff]  ;;  %v1183_v57 = vld [vmem:[#allocation6 + $0x58] sm:$0xff]  ;;  %vm751_vm10 = vcmp.lt.s32.totalorder %v453_v34, 8 }
  0x1f   : > { %435 = vmatpush.bf16.msra.mxu1 %v1160_v10  ;;  %v1192_v54 = vld [vmem:[#allocation6 + $0xa0] sm:$0xff]  ;;  %v1175_v59 = vld [vmem:[#allocation6 + $0x18] sm:$0xff]  ;;  %v1182_v62 = vld [vmem:[#allocation6 + $0x50] sm:$0xff] }
  0x20   : > { %536 = vmatpush.bf16.msra.mxu2 %v1168_v11  ;;  %657 = vmatpush.bf16.msra.mxu3 %v1178_v46  ;;  %v1191_v60 = vld [vmem:[#allocation6 + $0x98] sm:$0xff]  ;;  %v1174_v63 = vld [vmem:[#allocation6 + $0x10] sm:$0xff]  ;;  %v1181_v2 = vld [vmem:[#allocation6 + $0x48] sm:$0xff] }
  0x21   : > { %v1190_v0 = vld [vmem:[#allocation6 + $0x90] sm:$0xff]  ;;  %v1173_v5 = vld [vmem:[#allocation6 + $0x8] sm:$0xff]  ;;  %v1180_v9 = vld [vmem:[#allocation6 + $0x40] sm:$0xff] }
  0x22   : > { %354 = vmatpush.bf16.msra.mxu0 %v1151_v13  ;;  %v1189_v6 = vld [vmem:[#allocation6 + $0x88] sm:$0xff]  ;;  %v1172_v12 = vld [vmem:[#allocation6] sm:$0xff]  ;;  %vm1074_vm11 = vmpackc.low %vm273_vm2, %vm273_vm2 }
  0x23   : > { %436 = vmatpush.bf16.msra.mxu1 %v1159_v14  ;;  %v1188_v13 = vld [vmem:[#allocation6 + $0x80] sm:$0xff]  ;;  %vm1141_vm12 = vmpackc.low %vm751_vm10, %vm751_vm10 }
  0x24   : > { %537 = vmatpush.bf16.msra.mxu2 %v1167_v15  ;;  %658 = vmatpush.bf16.msra.mxu3 %v1177_v49 }
  0x26   : > { %355 = vmatpush.bf16.msra.mxu0 %v1150_v17 }
  0x27   : > { %437 = vmatpush.bf16.msra.mxu1 %v1158_v18 }
  0x28   : > { %538 = vmatpush.bf16.msra.mxu2 %v1166_v19  ;;  %659 = vmatpush.bf16.msra.mxu3 %v1176_v53 }
  0x2a   : > { %356 = vmatpush.bf16.msra.mxu0 %v1149_v23 }
  0x2b   : > { %438 = vmatpush.bf16.msra.mxu1 %v1157_v24 }
  0x2c   : > { %539 = vmatpush.bf16.msra.mxu2 %v1165_v27  ;;  %660 = vmatpush.bf16.msra.mxu3 %v1175_v59 }
  0x2e   : > { %357 = vmatpush.bf16.msra.mxu0 %v1148_v32 }
  0x2f   : > { %439 = vmatpush.bf16.msra.mxu1 %v1156_v33 }
  0x30   : > { %540 = vmatpush.bf16.msra.mxu2 %v1164_v36  ;;  %661 = vmatpush.bf16.msra.mxu3 %v1174_v63 }
  0x31   : > { %972 = vmatmul.msk.bf16.vlgmr.msra.gmra.mxu0 %vm970_vm5, %v971_v39 }
  0x32   : > { %440 = vmatmul.bf16.vlgmr.msra.gmra.mxu1 %v366_v40  ;;  %736 = vmatpush.bf16.msrb.mxu0 %v1187_v42 }
  0x33   : > { %1039 = vmatmul.msk.bf16.vlgmr.msra.gmra.mxu2 %vm1037_vm6, %v1038_v41  ;;  %822 = vmatpush.bf16.msrb.mxu1 %v1195_v44 }
  0x34   : > { %662 = vmatpush.bf16.msra.mxu3 %v1173_v5 }
  0x36   : > { %737 = vmatpush.bf16.msrb.mxu0 %v1186_v45  ;;  %v1229_v45 = vld [vmem:[%s1435_s4] ss:$0 sm:$0xff] }
  0x37   : > { %823 = vmatpush.bf16.msrb.mxu1 %v1194_v47 }
  0x38   : > { %663 = vmatpush.bf16.msra.mxu3 %v1172_v12 }
  0x3a   : > { %738 = vmatpush.bf16.msrb.mxu0 %v1185_v48 }
  0x3b   : > { %824 = vmatpush.bf16.msrb.mxu1 %v1193_v50 }
  0x3e   : > { %739 = vmatpush.bf16.msrb.mxu0 %v1184_v52 }
  0x3f   : > { %825 = vmatpush.bf16.msrb.mxu1 %v1192_v54 }
  0x42   : > { %740 = vmatpush.bf16.msrb.mxu0 %v1183_v57 }
  0x43   : > { %826 = vmatpush.bf16.msrb.mxu1 %v1191_v60 }
  0x46   : > { %741 = vmatpush.bf16.msrb.mxu0 %v1182_v62 }
  0x47   : > { %827 = vmatpush.bf16.msrb.mxu1 %v1190_v0 }
  0x4a   : > { %742 = vmatpush.bf16.msrb.mxu0 %v1181_v2 }
  0x4b   : > { %828 = vmatpush.bf16.msrb.mxu1 %v1189_v6 }
  0x4e   : > { %743 = vmatpush.bf16.msrb.mxu0 %v1180_v9 }
  0x4f   : > { %829 = vmatpush.bf16.msrb.mxu1 %v1188_v13 }
  0xae   : > { %v359_v55 = vpop.f32.mrf.mxu0 }
  0xaf   : > { %v364_v56 = vadd.f32 %v1228_v51, %v359_v55  ;;  %v441_v58 = vpop.f32.mrf.mxu1 }
  0xb1   : > { %v446_v61 = vadd.f32 %v441_v58, %v364_v56 }
  0xb6   : > { %v542_v1 = vpop.f32.mrf.mxu2  ;;  %v361_v4 = vpop.f32.mrf.mxu0 }
  0xb7   : > { %v547_v3 = vadd.f32 %v542_v1, %v446_v61  ;;  %v365_v8 = vadd.f32 %v1228_v51, %v361_v4  ;;  %v443_v11 = vpop.f32.mrf.mxu1 }
  0xb9   : > { %v551_v7 = vmin.f32 %v547_v3, 0.0  ;;  %v447_v14 = vadd.f32 %v443_v11, %v365_v8  ;;  %vm549_vm7 = vcmp.gt.f32.partialorder %v547_v3, 0.0 }
  0xbb   : > { %v553_v10 = vmul.f32 1.442695, %v551_v7 }
  0xbd   : > { %1230 = vpow2.f32 %v553_v10 }
  0xbe   : > { %v544_v15 = vpop.f32.mrf.mxu2 }
  0xbf   : > { %v548_v17 = vadd.f32 %v544_v15, %v447_v14 }
  0xc1   : > { %v552_v18 = vmin.f32 %v548_v17, 0.0  ;;  %vm550_vm8 = vcmp.gt.f32.partialorder %v548_v17, 0.0 }
  0xc3   : > { %v555_v19 = vmul.f32 1.442695, %v552_v18  ;;  %v1231_v20 = vpop.eup %1230 }
  0xc4   : > { %v1040_v21 = vadd.f32 -1.0, %v1231_v20 }
  0xc5   : > { %1232 = vpow2.f32 %v555_v19 }
  0xc6   : > { %v559_v23 = vsel %vm549_vm7, %v547_v3, %v1040_v21 }
  0xc7   : > { %v561_v26 = vrot.slane %v559_v23, 7 }
  0xcb   : > { %v1233_v22 = vpop.eup %1232 }
  0xcc   : > { %v1041_v24 = vadd.f32 -1.0, %v1233_v22 }
  0xce   : > { %v560_v25 = vsel %vm550_vm8, %v548_v17, %v1041_v24 }
  0xcf   : > { %v562_v27 = vrot.slane %v560_v25, 7 }
  0xd1   : > { %v563_v29 = vsel %vm268_vm0, %v561_v26, %v562_v27  ;;  %v564_v30 = vsel %vm268_vm0, %v562_v27, %v561_v26 }
  0xd2   : > { %v571_v31 = vsel %vm565_vm9, -1e+30, %v564_v30  ;;  %v574_v32 = vmax.f32 %v560_v25, %v563_v29 }
  0xd3   : > { %v573_v33 = vmax.f32 %v559_v23, %v571_v31 }
  0xd4   : > { %576 = vst [vmem:[#allocation2 + $0x8] sm:$0xff] %v574_v32 }
  0xd5   : > { %575 = vst [vmem:[#allocation2] sm:$0xff] %v573_v33 }
  0xdc   : > { %v577_v35 = vld [vmem:[#allocation2] ss:$2 sm:$0xff]  ;;  %v579_v36 = vld [vmem:[#allocation2 + $0x1] ss:$2 sm:$0xff] }
  0xdd   : > { %v580_v37 = vmax.f32 %v577_v35, %v579_v36 }
  0xdf   : > { %v670_v38 = vpack.c.bf16 %v580_v37, %v580_v37  ;;  %v585_v39 = vrot.slane %v580_v37, 7  ;;  %v750_v40 = vrot.slane %v580_v37, 1 }
  0xe1   : > { %744 = vmatmul.bf16.vlgmr.msrb.gmra.mxu0 %v670_v38  ;;  %v1075_v41 = vpack.c.bf16 %v585_v39, %v585_v39  ;;  %v1142_v42 = vpack.c.bf16 %v750_v40, %v750_v40 }
  0xe3   : > { %1076 = vmatmul.msk.bf16.vlgmr.msra.gmra.mxu3 %vm1074_vm11, %v1075_v41  ;;  %1143 = vmatmul.msk.bf16.vlgmr.msrb.gmra.mxu1 %vm1141_vm12, %v1142_v42 }
 0x15e   : > { %v745_v43 = vpop.f32.mrf.mxu0 }
 0x160   : > { %v831_v44 = vpop.f32.mrf.mxu1 }
 0x166   : > { %v665_v46 = vpop.f32.mrf.mxu3  ;;  %v747_v47 = vpop.f32.mrf.mxu0 }
 0x167   : > { %v669_v48 = vadd.f32 %v1229_v45, %v665_v46 }
 0x168   : > { %v833_v28 = vpop.f32.mrf.mxu1 }
 0x169   : > { %v749_v49 = vadd.f32 %v745_v43, %v669_v48 }
 0x16b   : > { %v835_v50 = vadd.f32 %v831_v44, %v749_v49 }
 0x16d   : > { %v837_v51 = vmin.f32 %v835_v50, 0.0  ;;  %vm836_vm13 = vcmp.gt.f32.partialorder %v835_v50, 0.0 }
 0x16e   : > { %v667_v52 = vpop.f32.mrf.mxu3 }
 0x16f   : > { %v838_v53 = vmul.f32 1.442695, %v837_v51 }
 0x171   : > { %1234 = vpow2.f32 %v838_v53 }
 0x177   : > { %v1235_v54 = vpop.eup %1234 }
 0x178   : > { %v1144_v55 = vadd.f32 -1.0, %v1235_v54 }
 0x17a   : > { %v841_v56 = vsel %vm836_vm13, %v835_v50, %v1144_v55 }
 0x17b   : > { %v842_v57 = vrot.slane %v841_v56, 7 }
 0x17d   : > { %v843_v58 = vsel %vm565_vm9, -1e+30, %v842_v57 }
 0x17e   : > { %v844_v59 = vmax.f32 %v841_v56, %v843_v58 }
 0x180   : > { %845 = vst [vmem:[#allocation3] sm:$0xff] %v844_v59 }
 0x187   : > { %v846_v60 = vld [vmem:[#allocation3] ss:$2 sm:$0xf]  ;;  %v848_v61 = vld [vmem:[#allocation3 + $0x1] ss:$2 sm:$0xf] }
 0x188   : > { %v849_v62 = vmax.f32 %v846_v60, %v848_v61 }
 0x18a   : > { %850 = vst [vmem:[%s256_s20] sm:$0xf] %v849_v62 }
 0x18b PF: > { %s17_s18 = sadd.s32 1, %s1310_s18  }
 0x18c   : > { %p14_p7 = scmp.ge.s32.totalorder %s17_s18, 4  }
 0x18e   :  { %16 = sbr.rel (!%p14_p7) target bundleno = 2 (0x2), region = 85 }
 0x193   :  { %870 = vsyncpa [#allocation5], 1 }
 0x194   :  { %872 = vsyncpa [#allocation5 + $0x1], 1 }
 0x195   :  { %873 = vsyncpa [#allocation7], 1 }

</bundles_post_ra>
